<compile_context>
chip_gen: v5e
topology: v5e:2x2
jax: 0.10.0
libtpu: 0.0.40
codegen_flags: <defaults>
</compile_context>

<pallas_src>
import jax
import jax.numpy as jnp
from jax.experimental import pallas as pl
from jax.experimental.pallas import tpu as pltpu


def classifier_kernel(x_ref, w_ref, b_ref, o_ref):
    # x_ref: (TB, F)  w_ref: (F, C)  b_ref: (1, C)  o_ref: (TB, C)
    x = x_ref[...]                       # native dtype straight to MXU
    w = w_ref[...]
    b = b_ref[...].astype(jnp.float32)

    # Linear: x @ W + b   (MXU matmul, f32 accumulation)
    logits = jnp.dot(x, w, preferred_element_type=jnp.float32) + b

    # ReLU
    act = jnp.maximum(logits, 0.0)

    # Numerically-stable softmax over the class axis (torch dim=1).
    m = jnp.max(act, axis=-1, keepdims=True)
    e = jnp.exp(act - m)
    denom = jnp.sum(e, axis=-1, keepdims=True)
    # Exact division: rows sum to 1 to f32 rounding (approx recip was not
    # accurate enough); cost is negligible vs streaming x from HBM.
    o_ref[...] = (e / denom).astype(o_ref.dtype)


_TARGET_TILE_BYTES = 2 << 20   # ~2 MiB x tile per buffer (~85% of HBM BW)


def _round_down8(n):
    return max(8, (n // 8) * 8)


def _round_up(n, m):
    return ((n + m - 1) // m) * m


def classifier_forward(x, w, b, *, target_tile_bytes=_TARGET_TILE_BYTES,
                       out_dtype=jnp.float32, vmem_limit_bytes=None):
    """x: (B, F), w: (F, C), b: (C,) -> (B, C) softmax probabilities."""
    B, F = x.shape
    Fw, C = w.shape
    assert F == Fw
    b2d = b.reshape(1, C).astype(jnp.float32)

    itemsize = jnp.dtype(x.dtype).itemsize
    f_pad = _round_up(F, 128)            # lane padding of the x tile in VMEM

    # --- batch tile selection (by bytes, layout-aware) ---------------------
    if B < 8:
        tb = B                           # full-array block (no (8, .) rule)
    else:
        tb = _round_down8(target_tile_bytes // (f_pad * itemsize))
        # Keep double-buffered x well inside v7x's 64 MiB VMEM even at big F.
        tb = min(tb, _round_down8((24 << 20) // (f_pad * itemsize)))
        if B >= 16:
            # Guarantee >= 2 grid steps so v7x's 2nd TensorCore is not idle.
            tb = min(tb, _round_up((B + 1) // 2, 8))
        else:
            tb = min(tb, 8)
        tb = max(tb, 8)

    grid = (pl.cdiv(B, tb),)             # partial last block masked by Pallas

    # --- VMEM budget ((8,128)-layout aware) --------------------------------
    if vmem_limit_bytes is None:
        out_item = jnp.dtype(out_dtype).itemsize
        need = (2 * tb * f_pad * itemsize                         # x (double-buffered)
                + 2 * tb * 128 * out_item                         # out (C=3 -> 128 lanes)
                + 2 * _round_up(F, 8) * 128 * jnp.dtype(w.dtype).itemsize  # weight
                + 2 * 8 * 128 * 4)                                # bias
        vmem_limit_bytes = max(need + (2 << 20), 16 << 20)        # small tiles -> v7x-safe

    return pl.pallas_call(
        classifier_kernel,
        out_shape=jax.ShapeDtypeStruct((B, C), out_dtype),
        grid=grid,
        in_specs=[
            pl.BlockSpec((tb, F), lambda i: (i, 0)),   # streamed batch tiles
            pl.BlockSpec((F, C), lambda i: (0, 0)),    # weight resident
            pl.BlockSpec((1, C), lambda i: (0, 0)),    # bias resident
        ],
        out_specs=pl.BlockSpec((tb, C), lambda i: (i, 0)),
        compiler_params=pltpu.CompilerParams(
            dimension_semantics=("parallel",),          # shard batch over TCs
            vmem_limit_bytes=vmem_limit_bytes,
        ),
    )(x, w, b2d)


def reference_forward(x, w, b):
    logits = x.astype(jnp.float32) @ w.astype(jnp.float32) + b
    act = jnp.maximum(logits, 0.0)
    return jax.nn.softmax(act, axis=1)


if __name__ == "__main__":
    key = jax.random.PRNGKey(0)
    kx, kw, kb, kx2 = jax.random.split(key, 4)

    B = 8          # batch
    F = 32         # features_length (synthetic)
    C = 3          # number of classes (fixed by the module)

    x = jax.random.normal(kx, (B, F), dtype=jnp.float32)
    # Deterministic Linear params (akin to torch's uniform(-1/sqrt(F), 1/sqrt(F)))
    bound = 1.0 / (F ** 0.5)
    w = jax.random.uniform(kw, (F, C), minval=-bound, maxval=bound, dtype=jnp.float32)
    b = jax.random.uniform(kb, (C,), minval=-bound, maxval=bound, dtype=jnp.float32)

    # Path 1: small batch, single block.
    out = classifier_forward(x, w, b)
    out = jax.block_until_ready(out)
    ref = reference_forward(x, w, b)
    assert out.shape == (B, C)
    assert jnp.allclose(out, ref, atol=2e-3, rtol=2e-3), "mismatch vs reference (small)"
    assert jnp.allclose(jnp.sum(out, axis=1), jnp.ones((B,)), atol=2e-3)

    # Path 2: multi-step grid with a partial (masked) last block, B % tb != 0.
    B2 = 20
    x2 = jax.random.normal(kx2, (B2, F), dtype=jnp.float32)
    out2 = classifier_forward(x2, w, b)
    out2 = jax.block_until_ready(out2)
    ref2 = reference_forward(x2, w, b)
    assert out2.shape == (B2, C)
    assert jnp.allclose(out2, ref2, atol=2e-3, rtol=2e-3), "mismatch vs reference (tiled)"
    assert jnp.allclose(jnp.sum(out2, axis=1), jnp.ones((B2,)), atol=2e-3)

    print("KERNEL_OK")
</pallas_src>

<mosaic_0001>
module attributes {stable_mosaic.version = 11 : i64} {
  func.func @classifier_kernel(%arg0: i32, %arg1: memref<8x32xf32, #tpu.memory_space<vmem>>, %arg2: memref<32x3xf32, #tpu.memory_space<vmem>>, %arg3: memref<1x3xf32, #tpu.memory_space<vmem>>, %arg4: memref<8x3xf32, #tpu.memory_space<vmem>>) attributes {dimension_semantics = [#tpu.dimension_semantics<parallel>], iteration_bounds = array<i64: 1>, scalar_prefetch = 0 : i64, scratch_operands = 0 : i64, tpu.core_type = #tpu.core_type<tc>, window_params = [{transform_indices = @transform_0, window_bounds = array<i64: 8, 32>}, {pipeline_mode = #tpu.pipeline_mode<synchronous>, transform_indices = @transform_1, window_bounds = array<i64: 32, 3>}, {pipeline_mode = #tpu.pipeline_mode<synchronous>, transform_indices = @transform_2, window_bounds = array<i64: 1, 3>}, {transform_indices = @transform_3, window_bounds = array<i64: 8, 3>}]} {
    %c0 = arith.constant 0 : index
    %c0_0 = arith.constant 0 : index
    %0 = vector.load %arg1[%c0, %c0_0] : memref<8x32xf32, #tpu.memory_space<vmem>>, vector<8x32xf32>
    %c0_1 = arith.constant 0 : index
    %c0_2 = arith.constant 0 : index
    %1 = vector.load %arg2[%c0_1, %c0_2] : memref<32x3xf32, #tpu.memory_space<vmem>>, vector<32x3xf32>
    %c0_3 = arith.constant 0 : index
    %c0_4 = arith.constant 0 : index
    %2 = vector.load %arg3[%c0_3, %c0_4] : memref<1x3xf32, #tpu.memory_space<vmem>>, vector<1x3xf32>
    %cst = arith.constant dense<0.000000e+00> : vector<8x3xf32>
    %3 = tpu.matmul %0, %1, %cst {dimension_numbers = #tpu.dot_dimension_numbers<[1], [0], [0], [1], [0, 0, 1, 1], [], []>} : vector<8x32xf32>, vector<32x3xf32>, vector<8x3xf32> -> vector<8x3xf32>
    %4 = vector.broadcast %2 : vector<1x3xf32> to vector<8x3xf32>
    %5 = arith.addf %3, %4 : vector<8x3xf32>
    %cst_5 = arith.constant 0.000000e+00 : f32
    %6 = vector.broadcast %cst_5 : f32 to vector<8x3xf32>
    %7 = arith.maximumf %5, %6 : vector<8x3xf32>
    %cst_6 = arith.constant dense<0xFF800000> : vector<8xf32>
    %8 = vector.multi_reduction <maximumf>, %7, %cst_6 [1] : vector<8x3xf32> to vector<8xf32>
    %9 = vector.shape_cast %8 : vector<8xf32> to vector<8x1xf32>
    %10 = vector.broadcast %9 : vector<8x1xf32> to vector<8x3xf32>
    %11 = arith.subf %7, %10 : vector<8x3xf32>
    %12 = math.exp %11 : vector<8x3xf32>
    %cst_7 = arith.constant dense<0.000000e+00> : vector<8xf32>
    %13 = vector.multi_reduction <add>, %12, %cst_7 [1] : vector<8x3xf32> to vector<8xf32>
    %14 = vector.shape_cast %13 : vector<8xf32> to vector<8x1xf32>
    %15 = vector.broadcast %14 : vector<8x1xf32> to vector<8x3xf32>
    %16 = arith.divf %12, %15 : vector<8x3xf32>
    %c0_8 = arith.constant 0 : index
    %c0_9 = arith.constant 0 : index
    %17 = vector.load %arg4[%c0_8, %c0_9] : memref<8x3xf32, #tpu.memory_space<vmem>>, vector<8x3xf32>
    tpu.vector_store %arg4[%c0_8, %c0_9], %16 {strides = array<i32>} : memref<8x3xf32, #tpu.memory_space<vmem>>, vector<8x3xf32>,
    return
  }
  func.func @transform_0(%arg0: i32) -> (i32, i32) {
    %c0_i32 = arith.constant 0 : i32
    %c0_i32_0 = arith.constant 0 : i32
    return %arg0, %c0_i32 : i32, i32
  }
  func.func @transform_1(%arg0: i32) -> (i32, i32) {
    %c0_i32 = arith.constant 0 : i32
    %c0_i32_0 = arith.constant 0 : i32
    %c0_i32_1 = arith.constant 0 : i32
    return %c0_i32, %c0_i32_0 : i32, i32
  }
  func.func @transform_2(%arg0: i32) -> (i32, i32) {
    %c0_i32 = arith.constant 0 : i32
    %c0_i32_0 = arith.constant 0 : i32
    %c0_i32_1 = arith.constant 0 : i32
    return %c0_i32, %c0_i32_0 : i32, i32
  }
  func.func @transform_3(%arg0: i32) -> (i32, i32) {
    %c0_i32 = arith.constant 0 : i32
    %c0_i32_0 = arith.constant 0 : i32
    return %arg0, %c0_i32 : i32, i32
  }
}

</mosaic_0001>

<bundles_post_ra>
// kernel: tpu_custom_call.1
= control target key start
LH: loop header
LB: loop body
LE: loop exit
PB: predicated region body
PF: predicated region fallthrough
CT: control target
= control target key end

     0   :  { %vm23_vm0 = vcmask 261120   ;;  %vm48_vm1 = vcmask 23552   ;;  %s128_s1 = inlined_call_operand.vmem [shape: f32[32,3], index: 1, kind: input, shape index: {}]   ;;  %s129_s2 = inlined_call_operand.vmem [shape: f32[1,3], index: 2, kind: input, shape index: {}]   ;;  %s130_s0 = inlined_call_operand.vmem [shape: f32[8,32], index: 0, kind: input, shape index: {}]   ;;  %s131_s3 = inlined_call_operand.vmem [shape: f32[8,3], index: 3, kind: output, shape index: {}]  }
   0x1   :  { %v18_v0 = vld [vmem:[%s128_s1 + $0x18] sm:$0xff]  ;;  %v17_v1 = vld [vmem:[%s128_s1 + $0x10] sm:$0xff]  ;;  %v16_v2 = vld [vmem:[%s128_s1 + $0x8] sm:$0xff] }
   0x2   :  { %39 = vmatpush.msra.mxu0 %v18_v0  ;;  %v15_v3 = vld [vmem:[%s128_s1] sm:$0xff] }
   0x3   :  { %v14_v4 = vld [vmem:[%s130_s0] sm:$0xff] }
   0x4   :  { %40 = vmatpush.msra.mxu0 %v17_v1  ;;  %v79_v5 = vld [vmem:[%s129_s2] ss:$0 sm:$0xff] }
   0x6   :  { %41 = vmatpush.msra.mxu0 %v16_v2 }
   0x8   :  { %42 = vmatpush.msra.mxu0 %v15_v3 }
   0x9   :  { %78 = vmatmul.msk.f32.vlgmr.msra.gmra.mxu0 %vm23_vm0, %v14_v4 }
  0x86   :  { %v44_v6 = vpop.f32.mrf.mxu0 }
  0x87   :  { %v45_v7 = vadd.f32 %v79_v5, %v44_v6 }
  0x89   :  { %v47_v8 = vmax.f32 %v45_v7, 0.0 }
  0x8b   :  { %v49_v9 = vsel %vm48_vm1, %v47_v8, -inf }
  0x8c   :  { %50 = vmax.xlane.f32.xlu0 %v49_v9 }
  0xff   :  { %v51_v10 = vpop.xlane.xlu0 %50 }
 0x100   :  { %v52_v11 = vsub.f32 %v47_v8, %v51_v10 }
 0x102   :  { %v53_v12 = vmul.f32 1.442695, %v52_v11 }
 0x104   :  { %80 = vpow2.f32 %v53_v12 }
 0x10a   :  { %v81_v13 = vpop.eup %80 }
 0x10b   :  { %v55_v14 = vsel %vm48_vm1, %v81_v13, 0.0 }
 0x10c   :  { %56 = vadd.xlane.f32.xlu0 %v55_v14 }
 0x17f   :  { %v57_v15 = vpop.xlane.xlu0 %56 }
 0x180   :  { %82 = vrcp.f32 %v57_v15  ;;  %v69_v19 = vand.u32 2147483648, %v57_v15  ;;  %v67_v21 = vand.u32 2147483647, %v57_v15  ;;  %vm63_vm3 = vweird.f32 %v57_v15 }
 0x182   :  { %v70_v23 = vor.u32 1.1754944e-38, %v69_v19  ;;  %vm68_vm5 = vcmp.eq.f32.partialorder %v67_v21, 8.507059e+37 }
 0x186   :  { %v83_v16 = vpop.eup %82 }
 0x187   :  { %v59_v17 = vmul.f32 %v83_v16, %v57_v15  ;;  %vm64_vm2 = vweird.f32 %v83_v16 }
 0x188   :  { %vm65_vm4 = vmor %vm63_vm3, %vm64_vm2 }
 0x189   :  { %v60_v18 = vsub.f32 1.0, %v59_v17 }
 0x18b   :  { %v61_v20 = vmul.f32 %v83_v16, %v60_v18 }
 0x18d   :  { %v62_v22 = vadd.f32 %v83_v16, %v61_v20 }
 0x18f   :  { %v66_v24 = vsel %vm65_vm4, %v83_v16, %v62_v22 }
 0x190   :  { %v71_v25 = vsel %vm68_vm5, %v70_v23, %v66_v24 }
 0x191   :  { %v72_v26 = vmul.f32 %v81_v13, %v71_v25 }
 0x193   :  { %73 = vst.msk [vmem:[%s131_s3] sm:$0xff] %vm48_vm1, %v72_v26 }

</bundles_post_ra>
